<compile_context>
chip_gen: v7x
topology: tpu7x:2x2x1
jax: 0.10.0
libtpu: 0.0.40
codegen_flags: <defaults>
</compile_context>

<pallas_src>
import jax
import jax.numpy as jnp
from jax.experimental import pallas as pl
from jax.experimental.pallas import tpu as pltpu


def _pooler_classifier_kernel(xcls_ref, wp_ref, bp_ref, wc_ref, bc_ref, out_ref):
    """Fused BERT pooler + (eval) dropout + classifier head.

    xcls_ref : [TB, H]   CLS-token hidden states, bf16 (seq dim squeezed by BlockSpec)
    wp_ref   : [H, H]    pooler dense weight, bf16, [in, out]
    bp_ref   : [1, H]    pooler dense bias, f32
    wc_ref   : [H, Cp]   classifier weight, bf16, [in, out], lane-padded to Cp=128
    bc_ref   : [1, Cp]   classifier bias, f32, lane-padded with large negative
    out_ref  : [TB, Cp]  logits, f32 (lane-dense store)
    """
    # BERT pooler: dense (MXU, bf16 operands, f32 accumulate) + bias (VPU) + tanh (EUP).
    pooled = jnp.dot(xcls_ref[...], wp_ref[...], preferred_element_type=jnp.float32)
    pooled = jnp.tanh(pooled + bp_ref[...])

    # Dropout: eval mode -> identity.
    # TODO(synk): training-mode dropout (p=0.5) would use pltpu.prng_seed +
    # pltpu.stateful_bernoulli; omitted to match inference semantics.

    # Classifier linear: hidden -> num_classes (lane-padded), f32 accumulate.
    # NOTE: pooled is re-cast to bf16 for the MXU; compounds bf16 error slightly.
    logits = jnp.dot(pooled.astype(jnp.bfloat16), wc_ref[...],
                     preferred_element_type=jnp.float32)
    out_ref[...] = logits + bc_ref[...]


def prepare_classifier_params(wp, bp, wc, bc, pad_bias_value=-1e30):
    """ONE-TIME (model-load) parameter prep, hoisted out of the per-call path.

    wp: [H, H], bp: [H], wc: [H, C], bc: [C]  (all [in, out] layout)
    Returns bf16 weights, f32 biases, classifier lane-padded to Cp = ceil(C/128)*128.
    Padded bias columns are filled with `pad_bias_value` (large negative) so the
    padded [B, Cp] logits are safe for downstream argmax/softmax.
    """
    H, C = wc.shape
    Cp = pl.cdiv(C, 128) * 128
    wp_bf = wp.astype(jnp.bfloat16)
    wc_bf = jnp.pad(wc, ((0, 0), (0, Cp - C))).astype(jnp.bfloat16)
    bp2 = bp.reshape(1, H).astype(jnp.float32)
    bc2 = jnp.pad(bc.astype(jnp.float32), (0, Cp - C),
                  constant_values=pad_bias_value).reshape(1, Cp)
    return (wp_bf, bp2, wc_bf, bc2)


def _pick_batch_tile(batch):
    """Largest power-of-two tile (multiple of 8 sublanes) that divides batch."""
    for tb in (512, 256, 128, 64, 32, 16, 8):
        if batch % tb == 0:
            return tb
    return batch  # tiny batch: single tile equal to full dim (valid per (8,128) rule)


def classifier_head(hidden_sbh, params, num_classes):
    """Per-call path: fused pooler + classifier Pallas kernel.

    hidden_sbh : [S, B, H] bf16 backbone activations (serving layout: seq index
                 0 is one contiguous [B, H] CLS slab -> contiguous DMA).
    params     : output of prepare_classifier_params (model-load constants).
    returns logits [B, num_classes] float32.
    """
    wp_bf, bp2, wc_bf, bc2 = params
    S, B, H = hidden_sbh.shape
    Cp = wc_bf.shape[1]

    TB = _pick_batch_tile(B)
    nb = B // TB

    out = pl.pallas_call(
        _pooler_classifier_kernel,
        out_shape=jax.ShapeDtypeStruct((B, Cp), jnp.float32),
        grid=(nb,),
        in_specs=[
            # CLS slice folded into the BlockSpec: the (leading) seq dim is a
            # squeezed size-1 block pinned at block 0; only the contiguous
            # [TB, H] CLS slab is DMA'd per grid step.
            pl.BlockSpec((None, TB, H), lambda i: (0, i, 0)),
            # Weights/biases: constant block index across the batch grid ->
            # stay VMEM-resident, not re-DMA'd per step.
            pl.BlockSpec((H, H), lambda i: (0, 0)),
            pl.BlockSpec((1, H), lambda i: (0, 0)),
            pl.BlockSpec((H, Cp), lambda i: (0, 0)),
            pl.BlockSpec((1, Cp), lambda i: (0, 0)),
        ],
        out_specs=pl.BlockSpec((TB, Cp), lambda i: (i, 0)),
        compiler_params=pltpu.CompilerParams(
            # Batch tiles are independent -> shard across v7x's 2 TensorCores
            # at serving batch (harmless no-op on v5e/v6e / at nb=1).
            dimension_semantics=("parallel",),
            # TODO(synk): at serving H (768/1024) and large batch tiles, set
            # vmem_limit_bytes explicitly and re-derive TB for v7x's 64 MiB
            # physical / 32 MiB scoped VMEM (and v5e's 16 MiB scoped default).
        ),
    )(hidden_sbh, wp_bf, bp2, wc_bf, bc2)

    # Trailing slice only to match the module's [B, num_classes] return shape;
    # since padded bias columns are large-negative, a consumer could take the
    # padded [B, Cp] output directly and drop this op.
    return out[:, :num_classes]


if __name__ == "__main__":
    # Small, deterministic synthetic setup consistent with the module:
    #   batch=2, seq=8, hidden=32 (stand-in for bert.config.hidden_size),
    #   num_classes=50.
    B, S, H, C = 2, 8, 32, 50

    key = jax.random.PRNGKey(0)
    k_x, k_wp, k_bp, k_wc, k_bc = jax.random.split(key, 5)

    # Synthetic BERT last_hidden_state (the backbone itself is not reproduced).
    x = jax.random.normal(k_x, (B, S, H), dtype=jnp.float32)

    # Pooler params (nn.Linear(H, H) -> stored here as [in, out]).
    wp = jax.random.normal(k_wp, (H, H), dtype=jnp.float32) * 0.02
    bp = jax.random.normal(k_bp, (H,), dtype=jnp.float32) * 0.02
    # Classifier params (nn.Linear(H, C) -> stored here as [in, out]).
    wc = jax.random.normal(k_wc, (H, C), dtype=jnp.float32) * 0.02
    bc = jax.random.normal(k_bc, (C,), dtype=jnp.float32) * 0.02

    # ---- One-time model-load prep (hoisted out of the per-call path). ----
    params = prepare_classifier_params(wp, bp, wc, bc)

    # Serving-layout activations: backbone emits [S, B, H] bf16 so seq index 0
    # (the CLS rows) is one contiguous [B, H] slab; the transpose here only
    # builds the demo input and is not part of the per-call hot path.
    x_sbh = jnp.transpose(x, (1, 0, 2)).astype(jnp.bfloat16)

    head = jax.jit(classifier_head, static_argnums=(2,))
    preds = head(x_sbh, params, C)
    preds = jax.block_until_ready(preds)

    # Pure-JAX f32 reference of the fused head (bf16 activations/weights in the
    # kernel => loosened tolerance; errors ~1e-3 at these magnitudes).
    pooled_ref = jnp.tanh(x[:, 0, :] @ wp + bp)
    preds_ref = pooled_ref @ wc + bc
    assert preds.shape == (B, C)
    assert jnp.allclose(preds, preds_ref, atol=2e-2, rtol=2e-2), "mismatch vs reference"

    print("KERNEL_OK")
</pallas_src>

<mosaic_0001>
module attributes {stable_mosaic.version = 11 : i64} {
  func.func @_pooler_classifier_kernel(%arg0: i32, %arg1: memref<1x2x32xbf16, #tpu.memory_space<vmem>>, %arg2: memref<32x32xbf16, #tpu.memory_space<vmem>>, %arg3: memref<1x32xf32, #tpu.memory_space<vmem>>, %arg4: memref<32x128xbf16, #tpu.memory_space<vmem>>, %arg5: memref<1x128xf32, #tpu.memory_space<vmem>>, %arg6: memref<2x128xf32, #tpu.memory_space<vmem>>) attributes {dimension_semantics = [#tpu.dimension_semantics<parallel>], iteration_bounds = array<i64: 1>, scalar_prefetch = 0 : i64, scratch_operands = 0 : i64, tpu.core_type = #tpu.core_type<tc>, window_params = [{transform_indices = @transform_0, window_bounds = array<i64: 1, 2, 32>}, {pipeline_mode = #tpu.pipeline_mode<synchronous>, transform_indices = @transform_1, window_bounds = array<i64: 32, 32>}, {pipeline_mode = #tpu.pipeline_mode<synchronous>, transform_indices = @transform_2, window_bounds = array<i64: 1, 32>}, {pipeline_mode = #tpu.pipeline_mode<synchronous>, transform_indices = @transform_3, window_bounds = array<i64: 32, 128>}, {pipeline_mode = #tpu.pipeline_mode<synchronous>, transform_indices = @transform_4, window_bounds = array<i64: 1, 128>}, {transform_indices = @transform_5, window_bounds = array<i64: 2, 128>}]} {
    %c0 = arith.constant 0 : index
    %c0_0 = arith.constant 0 : index
    %c0_1 = arith.constant 0 : index
    %0 = vector.load %arg1[%c0, %c0_0, %c0_1] : memref<1x2x32xbf16, #tpu.memory_space<vmem>>, vector<1x2x32xbf16>
    %1 = vector.shape_cast %0 : vector<1x2x32xbf16> to vector<2x32xbf16>
    %c0_2 = arith.constant 0 : index
    %c0_3 = arith.constant 0 : index
    %2 = vector.load %arg2[%c0_2, %c0_3] : memref<32x32xbf16, #tpu.memory_space<vmem>>, vector<32x32xbf16>
    %cst = arith.constant dense<0.000000e+00> : vector<2x32xf32>
    %3 = tpu.matmul %1, %2, %cst {dimension_numbers = #tpu.dot_dimension_numbers<[1], [0], [0], [1], [0, 0, 1, 1], [], []>} : vector<2x32xbf16>, vector<32x32xbf16>, vector<2x32xf32> -> vector<2x32xf32>
    %c0_4 = arith.constant 0 : index
    %c0_5 = arith.constant 0 : index
    %4 = vector.load %arg3[%c0_4, %c0_5] : memref<1x32xf32, #tpu.memory_space<vmem>>, vector<1x32xf32>
    %5 = vector.broadcast %4 : vector<1x32xf32> to vector<2x32xf32>
    %6 = arith.addf %3, %5 : vector<2x32xf32>
    %7 = math.tanh %6 : vector<2x32xf32>
    %8 = arith.truncf %7 : vector<2x32xf32> to vector<2x32xbf16>
    %c0_6 = arith.constant 0 : index
    %c0_7 = arith.constant 0 : index
    %9 = vector.load %arg4[%c0_6, %c0_7] : memref<32x128xbf16, #tpu.memory_space<vmem>>, vector<32x128xbf16>
    %cst_8 = arith.constant dense<0.000000e+00> : vector<2x128xf32>
    %10 = tpu.matmul %8, %9, %cst_8 {dimension_numbers = #tpu.dot_dimension_numbers<[1], [0], [0], [1], [0, 0, 1, 1], [], []>} : vector<2x32xbf16>, vector<32x128xbf16>, vector<2x128xf32> -> vector<2x128xf32>
    %c0_9 = arith.constant 0 : index
    %c0_10 = arith.constant 0 : index
    %11 = vector.load %arg5[%c0_9, %c0_10] : memref<1x128xf32, #tpu.memory_space<vmem>>, vector<1x128xf32>
    %12 = vector.broadcast %11 : vector<1x128xf32> to vector<2x128xf32>
    %13 = arith.addf %10, %12 : vector<2x128xf32>
    %c0_11 = arith.constant 0 : index
    %c0_12 = arith.constant 0 : index
    %14 = vector.load %arg6[%c0_11, %c0_12] : memref<2x128xf32, #tpu.memory_space<vmem>>, vector<2x128xf32>
    tpu.vector_store %arg6[%c0_11, %c0_12], %13 {strides = array<i32>} : memref<2x128xf32, #tpu.memory_space<vmem>>, vector<2x128xf32>,
    return
  }
  func.func @transform_0(%arg0: i32) -> (i32, i32, i32) {
    %c0_i32 = arith.constant 0 : i32
    %c0_i32_0 = arith.constant 0 : i32
    %c0_i32_1 = arith.constant 0 : i32
    return %c0_i32, %arg0, %c0_i32_0 : i32, i32, i32
  }
  func.func @transform_1(%arg0: i32) -> (i32, i32) {
    %c0_i32 = arith.constant 0 : i32
    %c0_i32_0 = arith.constant 0 : i32
    %c0_i32_1 = arith.constant 0 : i32
    return %c0_i32, %c0_i32_0 : i32, i32
  }
  func.func @transform_2(%arg0: i32) -> (i32, i32) {
    %c0_i32 = arith.constant 0 : i32
    %c0_i32_0 = arith.constant 0 : i32
    %c0_i32_1 = arith.constant 0 : i32
    return %c0_i32, %c0_i32_0 : i32, i32
  }
  func.func @transform_3(%arg0: i32) -> (i32, i32) {
    %c0_i32 = arith.constant 0 : i32
    %c0_i32_0 = arith.constant 0 : i32
    %c0_i32_1 = arith.constant 0 : i32
    return %c0_i32, %c0_i32_0 : i32, i32
  }
  func.func @transform_4(%arg0: i32) -> (i32, i32) {
    %c0_i32 = arith.constant 0 : i32
    %c0_i32_0 = arith.constant 0 : i32
    %c0_i32_1 = arith.constant 0 : i32
    return %c0_i32, %c0_i32_0 : i32, i32
  }
  func.func @transform_5(%arg0: i32) -> (i32, i32) {
    %c0_i32 = arith.constant 0 : i32
    %c0_i32_0 = arith.constant 0 : i32
    return %arg0, %c0_i32 : i32, i32
  }
}

</mosaic_0001>

<bundles_post_ra>
// kernel: classifier_head.1
= control target key start
LH: loop header
LB: loop body
LE: loop exit
PB: predicated region body
PF: predicated region fallthrough
CT: control target
= control target key end

     0   :  { %10 = vsyncpa [#allocation3], 0  ;;  %s455_s0 = inlined_call_operand.hbm [shape: bf16[8,2,32], index: 0, kind: input, shape index: {}]   ;;  %s456_s1 = inlined_call_operand.hbm [shape: bf16[32,32], index: 1, kind: input, shape index: {}]   ;;  %s457_s2 = inlined_call_operand.vmem [shape: f32[1,32], index: 2, kind: input, shape index: {}]   ;;  %s458_s3 = inlined_call_operand.hbm [shape: bf16[32,128], index: 3, kind: input, shape index: {}]   ;;  %s459_s4 = inlined_call_operand.vmem [shape: f32[1,128], index: 4, kind: input, shape index: {}]   ;;  %s460_s5 = inlined_call_operand.hbm [shape: f32[2,128], index: 5, kind: output, shape index: {}]  }
   0x1   :  { %11 = vsyncpa [#allocation6], 0 }
   0x2   :  { %12 = vsyncpa [#allocation4], 0  ;;  %s352_s18 = smov [#allocation5]   ;;  %s258_s22 = scalar_lea.hbm %s456_s1, 256 }
   0x3   :  { %s28_s19 = sshll.u32 %s352_s18, 4  ;;  %p259_p0 = scmp.ne.s32.totalorder %s456_s1, %s258_s22  ;;  %s29_s19 = int_to_ptr.vmem [resolvable:$true] %s28_s19 }
   0x4   :  { %p262_p1 = scmp.lt.u32.totalorder %s258_s22, %s456_s1 }
   0x6   :  { %p264_p2 = pnand %p262_p1, %p259_p0 }
   0x8   :  { %267 = shalt.err (!%p264_p2)
}
   0x9   :  { %s268_s27 = scalar_lea.vmem %s29_s19, 256  ;;  %p273_p4 = scmp.lt.s32.totalorder %s29_s19, %s29_s19 }
   0xa   :  { %p269_p3 = scmp.ne.s32.totalorder %s29_s19, %s268_s27  ;;  %p274_p5 = scmp.lt.s32.totalorder %s268_s27, %s268_s27 }
   0xc   :  { %p275_p6 = por %p274_p5, %p273_p4 }
   0xe   :  { %p276_p7 = pnand %p275_p6, %p269_p3 }
  0x10   :  { %279 = shalt.err (!%p276_p7)
}
  0x11   :  { %s353_s28 = smov 64   ;;  %s354_s29 = smov 4  }
  0x12   :  { %34 = dma.hbm_to_vmem [thread:$0]  %s456_s1, 256, %s29_s19, [#allocation6], %s353_s28, %s353_s28, %s354_s29  }
  0x13   :  { %s355_s7 = smov [#allocation2]   ;;  %s356_s9 = smov [#allocation7]  }
  0x14   :  { %s19_s8 = sshll.u32 %s355_s7, 4  ;;  %s42_s10 = sshll.u32 %s356_s9, 4  ;;  %s20_s8 = int_to_ptr.vmem [resolvable:$true] %s19_s8  ;;  %s43_s10 = int_to_ptr.vmem [resolvable:$true] %s42_s10 }
  0x15   :  { %s280_s13 = scalar_lea.hbm %s455_s0, 16  ;;  %s282_s18 = scalar_lea.hbm %s455_s0, 128 }
  0x16   :  { %p281_p8 = scmp.ne.s32.totalorder %s455_s0, %s280_s13  ;;  %p283_p9 = scmp.lt.u32.totalorder %s282_s18, %s280_s13 }
  0x17   :  { %p284_p10 = scmp.lt.u32.totalorder %s280_s13, %s455_s0 }
  0x19   :  { %p285_p11 = por %p284_p10, %p283_p9 }
  0x1b   :  { %p286_p12 = pnand %p285_p11, %p281_p8 }
  0x1d   :  { %289 = shalt.err (!%p286_p12)
}
  0x1e   :  { %s290_s19 = scalar_lea.vmem %s20_s8, 16  ;;  %s294_s21 = scalar_lea.vmem %s20_s8, 32 }
  0x1f   :  { %p291_p13 = scmp.ne.s32.totalorder %s20_s8, %s290_s19  ;;  %p295_p0 = scmp.lt.s32.totalorder %s20_s8, %s20_s8 }
  0x20   :  { %p296_p1 = scmp.lt.s32.totalorder %s294_s21, %s290_s19 }
  0x22   :  { %p297_p2 = por %p296_p1, %p295_p0 }
  0x24   :  { %p298_p3 = pnand %p297_p2, %p291_p13 }
  0x26   :  { %301 = shalt.err (!%p298_p3)
}
  0x27   :  { %22 = dma.hbm_to_vmem [thread:$0]  %s455_s0, 16, %s20_s8, [#allocation3]  }
  0x28   :  { %s302_s26 = scalar_lea.hbm %s458_s3, 256 }
  0x29   :  { %p303_p4 = scmp.ne.s32.totalorder %s458_s3, %s302_s26  ;;  %p306_p5 = scmp.lt.u32.totalorder %s302_s26, %s458_s3 }
  0x2b   :  { %p308_p6 = pnand %p306_p5, %p303_p4 }
  0x2d   :  { %311 = shalt.err (!%p308_p6)
}
  0x2e   :  { %s312_s9 = scalar_lea.vmem %s43_s10, 256  ;;  %p317_p8 = scmp.lt.s32.totalorder %s43_s10, %s43_s10 }
  0x2f   :  { %p313_p7 = scmp.ne.s32.totalorder %s43_s10, %s312_s9  ;;  %p318_p9 = scmp.lt.s32.totalorder %s312_s9, %s312_s9 }
  0x31   :  { %p319_p10 = por %p318_p9, %p317_p8 }
  0x33   :  { %p320_p11 = pnand %p319_p10, %p313_p7 }
  0x35   :  { %323 = shalt.err (!%p320_p11)
}
  0x36   :  { %48 = dma.hbm_to_vmem [thread:$0]  %s458_s3, 256, %s43_s10, [#allocation6], %s353_s28, %s353_s28, %s354_s29  }
  0x37   :  { %346 = dma.done.wait [#allocation3], 16  }
  0x38   :  { %347 = vsyncadd [#allocation3], 4294967280 }
  0x39   :  { %348 = dma.done.wait [#allocation6], 512  }
  0x3a   :  { %349 = vsyncadd [#allocation6], 4294966784  ;;  %v357_v0 = vmov 0.0   ;;  %vm358_vm0 = vmmov 0   ;;  %v252_v1 = vld [vmem:[#allocation5] sm:$0xff]   ;;  %v253_v2 = vld [vmem:[#allocation5 + $0x8] sm:$0xff]  }
  0x3b   :  { %228 = vmatprep.subr.bf16.mxu0 %v357_v0  ;;  %232 = vmatprep.mubr.msk.bf16.mxu0 %vm358_vm0, %v357_v0  ;;  %v61_v3 = vld [vmem:[#allocation2] sm:$0x1]  ;;  %vm85_vm1 = vcmask 261120   ;;  %v254_v4 = vld [vmem:[#allocation7] sm:$0xff]   ;;  %s359_s11 = smov [#allocation8]  }
  0x3c   :  { %236 = vmatprep.subr.bf16.mxu1 %v357_v0  ;;  %240 = vmatprep.mubr.msk.bf16.mxu1 %vm358_vm0, %v357_v0  ;;  %v255_v5 = vld [vmem:[#allocation7 + $0x8] sm:$0xff]   ;;  %s204_s12 = sshll.u32 %s359_s11, 4  ;;  %s205_s12 = int_to_ptr.vmem [resolvable:$true] %s204_s12 }
  0x3d   :  { %229 = vmatpush3.bf16.msra.mxu0 %v252_v1  ;;  %237 = vmatpush3.bf16.msra.mxu1 %v254_v4  ;;  %v214_v6 = vld [vmem:[%s457_s2] ss:$0 sm:$0xff]  ;;  %s324_s2 = scalar_lea.vmem %s205_s12, 32  ;;  %p329_p13 = scmp.lt.s32.totalorder %s205_s12, %s205_s12 }
  0x3e   :  { %230 = vmatprep.subr.bf16.mxu0 %v357_v0  ;;  %238 = vmatprep.subr.bf16.mxu1 %v357_v0  ;;  %v218_v14 = vld [vmem:[%s459_s4] ss:$0 sm:$0xff]  ;;  %p325_p12 = scmp.ne.s32.totalorder %s205_s12, %s324_s2  ;;  %p330_p0 = scmp.lt.s32.totalorder %s324_s2, %s324_s2 }
  0x40   :  { %p331_p1 = por %p330_p0, %p329_p13 }
  0x41   :  { %231 = vmatpush3.bf16.msra.mxu0 %v253_v2  ;;  %239 = vmatpush3.bf16.msra.mxu1 %v255_v5 }
  0x42   :  { %p332_p2 = pnand %p331_p1, %p325_p12 }
  0x44   :  { %233 = vmatmul.mubr.msk.bf16.vlgmr.msra.gmra.mrb[0].mxu0 %vm85_vm1, %v61_v3 }
 0x117   :  { %v123_v7 = vpop.f32.mrb[0].mxu0 }
 0x118   :  { %v124_v8 = vadd.f32 %v214_v6, %v123_v7  ;;  %v234_v9 = vpop.f32.mrb[1].mxu0 }
 0x119   :  { %v126_v10 = vpop.f32.mrb[2].mxu0 }
 0x11a   :  { %256 = vtanh.f32 %v124_v8  ;;  %v235_v11 = vpop.f32.mrb[3].mxu0 }
 0x124   :  { %v257_v12 = vpop.eup %256 }
 0x125   :  { %v130_v13 = vpack.c.bf16 %v257_v12, %v257_v12 }
 0x127   :  { %241 = vmatmul.mubr.msk.bf16.vlgmr.msra.gmra.mrb[0].mxu1 %vm85_vm1, %v130_v13 }
 0x1fa   :  { %v191_v15 = vpop.f32.mrb[0].mxu1 }
 0x1fb   :  { %v192_v16 = vadd.f32 %v218_v14, %v191_v15  ;;  %v242_v17 = vpop.f32.mrb[1].mxu1 }
 0x1fc   :  { %v194_v18 = vpop.f32.mrb[2].mxu1 }
 0x1fd   :  { %197 = vst [vmem:[#allocation8] sm:$0x3] %v192_v16  ;;  %v243_v19 = vpop.f32.mrb[3].mxu1 }
 0x1fe   :  { %335 = shalt.err (!%p332_p2)
}
 0x1ff   :  { %s336_s4 = scalar_lea.hbm %s460_s5, 32 }
 0x200   :  { %p337_p3 = scmp.ne.s32.totalorder %s460_s5, %s336_s4  ;;  %p340_p4 = scmp.lt.u32.totalorder %s336_s4, %s460_s5 }
 0x202   :  { %p342_p5 = pnand %p340_p4, %p337_p3 }
 0x204   :  { %345 = shalt.err (!%p342_p5)
}
 0x205   :  { %207 = dma.vmem_to_hbm [thread:$0]  %s205_s12, 32, %s460_s5, [#allocation4]  }
 0x206   :  { %350 = dma.done.wait [#allocation4], 32  }
 0x207   :  { %351 = vsyncadd [#allocation4], 4294967264 }
 0x208   :  { %211 = vsyncpa [#allocation3], 1 }
 0x209   :  { %212 = vsyncpa [#allocation6], 1 }
 0x20a   :  { %213 = vsyncpa [#allocation4], 1 }

</bundles_post_ra>
